<compile_context>
chip_gen: v5e
topology: v5e:2x2
jax: 0.10.0
libtpu: 0.0.40
codegen_flags: <defaults>
</compile_context>

<pallas_src>
import functools

import jax
import jax.numpy as jnp
from jax.experimental import pallas as pl
from jax.experimental.pallas import tpu as pltpu

_LN_EPS = 1e-5                      # PyTorch nn.LayerNorm default
_INV_SQRT2 = 0.7071067811865476
_LANE = 128                         # pad H to a multiple of this
# Optional v6e/v7x micro-opt (moves GELU transcendental to the EUP). Off by default to keep
# exact nn.GELU() (erf) semantics; flip only after validating against the bf16 tolerance.
_USE_TANH_GELU = False


# --------------------------------------------------------------------------- kernel

def _layer_norm(h, gamma, beta, *, h_real):
    """Single-pass LayerNorm over the last dim.

    Wrapper invariant: padded lanes of h are exactly zero (zero-padded x, weight
    rows/cols, biases, gamma, beta), so unmasked sums equal masked sums; we only
    divide by the real feature count h_real.
    """
    inv_n = jnp.float32(1.0 / h_real)
    mu = jnp.sum(h, axis=-1, keepdims=True) * inv_n
    ms = jnp.sum(h * h, axis=-1, keepdims=True) * inv_n
    var = jnp.maximum(ms - mu * mu, 0.0)
    return (h - mu) * jax.lax.rsqrt(var + _LN_EPS) * gamma + beta


def _gelu(h):
    if _USE_TANH_GELU:
        return jax.nn.gelu(h, approximate=True)      # tanh form -> EUP
    return 0.5 * h * (1.0 + jax.lax.erf(h * jnp.float32(_INV_SQRT2)))   # exact, matches nn.GELU()


def _residual_block_kernel(x_ref, w1_ref, b1_ref, g1_ref, be1_ref,
                           w2_ref, b2_ref, g2_ref, be2_ref, o_ref,
                           *, h_real):
    x = x_ref[...].astype(jnp.float32)                      # (TM, Hp) f32

    # Linear 1: bf16 MXU operands, f32 accumulation.
    h = jnp.dot(x.astype(jnp.bfloat16), w1_ref[...],
                preferred_element_type=jnp.float32) + b1_ref[...]

    # LayerNorm 1 (f32 vector math).
    h = _layer_norm(h, g1_ref[...], be1_ref[...], h_real=h_real)

    # GELU.
    h = _gelu(h)

    # Dropout(0.1): identity in eval mode.
    # TODO(synk): training-mode dropout (stateful PRNG mask + 1/(1-p) scaling) not implemented.

    # Linear 2: bf16 MXU operands, f32 accumulation.
    h = jnp.dot(h.astype(jnp.bfloat16), w2_ref[...],
                preferred_element_type=jnp.float32) + b2_ref[...]

    # LayerNorm 2.
    h = _layer_norm(h, g2_ref[...], be2_ref[...], h_real=h_real)

    # Residual add.
    o_ref[...] = (x + h).astype(o_ref.dtype)


# --------------------------------------------------------------------------- param prep

def prepare_params(params):
    """One-time parameter prep (outside the per-call jitted path):
    transpose Linear weights (out,in)->(in,out), zero-pad H to a lane-dense multiple
    of 128, cast matmul weights to bf16, reshape vectors to (1, Hp).
    Zero padding is load-bearing: the kernel's LayerNorm relies on padded lanes being 0."""
    h = params["w1"].shape[0]
    hp = max(_LANE, ((h + _LANE - 1) // _LANE) * _LANE)

    def pad2(w):                       # (H, H) -> (Hp, Hp), zero padding
        return jnp.pad(w, ((0, hp - h), (0, hp - h)))

    def pad1(v):                       # (H,) -> (1, Hp), zero padding
        return jnp.pad(v, (0, hp - h)).reshape(1, hp).astype(jnp.float32)

    w1 = pad2(params["w1"].T).astype(jnp.bfloat16)
    w2 = pad2(params["w2"].T).astype(jnp.bfloat16)
    return (w1, pad1(params["b1"]), pad1(params["g1"]), pad1(params["be1"]),
            w2, pad1(params["b2"]), pad1(params["g2"]), pad1(params["be2"]))


# --------------------------------------------------------------------------- sizing

@functools.lru_cache(maxsize=None)
def _vmem_capacity_bytes():
    try:
        return int(pltpu.get_tpu_info().vmem_capacity_bytes)
    except Exception:
        return 64 << 20            # conservative fallback (v7x per-TC VMEM)


def _fixed_bytes(hp):
    # Two single-buffered bf16 weights + six (1, Hp) f32 vectors (single-buffered).
    return 2 * hp * hp * 2 + 6 * hp * 4


def _per_row_bytes(hp):
    # Double-buffered x + out f32 tiles (4 * Hp * 4B per row) plus ~10 f32-equivalent
    # in-kernel temporaries per row (f32/bf16 activation copies, LN stats, residual).
    return (4 + 10) * hp * 4


def _pick_tm(m, hp):
    cap = _vmem_capacity_bytes()
    avail = int(0.80 * cap) - _fixed_bytes(hp)
    tm_fit = max(8, (avail // _per_row_bytes(hp)) // 8 * 8) if avail > 0 else 8
    tm = min(512, tm_fit)                       # 512 amortizes ~0.35us/step grid overhead
    m8 = ((m + 7) // 8) * 8
    tm = min(tm, m8)
    # Keep at least 2 grid steps when rows allow so the "parallel" axis can fill both
    # TensorCores on v7x and the software pipeline stays warm.
    if m > 8 and pl.cdiv(m, tm) < 2:
        tm = max(8, ((pl.cdiv(m, 2) + 7) // 8) * 8)
    return tm


def _vmem_limit(tm, hp):
    cap = _vmem_capacity_bytes()
    need = int(1.3 * (_fixed_bytes(hp) + _per_row_bytes(hp) * tm))
    return max(16 << 20, min(need, int(0.90 * cap)))


def _fixed_spec(shape):
    """BlockSpec for a grid-invariant operand: index_map is constant and the block is
    single-buffered (no point double-buffering a block that never changes)."""
    fixed = lambda i: (0, 0)
    try:
        return pl.BlockSpec(shape, fixed, pipeline_mode=pl.Buffered(1))
    except TypeError:   # older BlockSpec signature without pipeline_mode
        return pl.BlockSpec(shape, fixed)


# --------------------------------------------------------------------------- wrapper

@jax.jit
def residual_block(x, prepped):
    """x: (..., H) float32. prepped: output of prepare_params()."""
    h_real = x.shape[-1]
    w1 = prepped[0]
    hp = w1.shape[0]

    x2d = x.reshape(-1, h_real)
    m = x2d.shape[0]

    # Lane (H) padding only. Rows (M) are NOT padded: the last grid block may be
    # partial; LayerNorm is row-local so garbage rows never affect real rows and
    # their writes are dropped by the clamped writeback.
    if hp != h_real:
        x2d = jnp.pad(x2d, ((0, 0), (0, hp - h_real)))

    tm = _pick_tm(m, hp)
    n_blocks = pl.cdiv(m, tm)
    row = lambda i: (i, 0)

    # TODO(synk): for very large H (2*Hp^2 bf16 + activations > ~0.8*VMEM, e.g. Hp >= ~2816
    # on v7x's 64 MiB per-TC VMEM) the resident-weight strategy needs an extra N/K grid axis
    # with an f32 accumulator (or fp8 weights); not implemented here.
    kernel = functools.partial(_residual_block_kernel, h_real=h_real)
    out2d = pl.pallas_call(
        kernel,
        out_shape=jax.ShapeDtypeStruct((m, hp), x.dtype),
        grid=(n_blocks,),
        in_specs=[
            pl.BlockSpec((tm, hp), row),   # x tile (double-buffered)
            _fixed_spec((hp, hp)),         # w1 (bf16, resident, single-buffered)
            _fixed_spec((1, hp)),          # b1
            _fixed_spec((1, hp)),          # g1
            _fixed_spec((1, hp)),          # be1
            _fixed_spec((hp, hp)),         # w2 (bf16, resident, single-buffered)
            _fixed_spec((1, hp)),          # b2
            _fixed_spec((1, hp)),          # g2
            _fixed_spec((1, hp)),          # be2
        ],
        out_specs=pl.BlockSpec((tm, hp), row),
        compiler_params=pltpu.CompilerParams(
            dimension_semantics=("parallel",),
            vmem_limit_bytes=_vmem_limit(tm, hp),
        ),
    )(x2d, *prepped)

    if hp != h_real:
        out2d = out2d[:, :h_real]
    return out2d.reshape(x.shape)


# --------------------------------------------------------------------------- test harness

def init_params(key, hidden):
    """Deterministic synthetic init matching nn.Linear / nn.LayerNorm shapes."""
    k1, k2, k3, k4 = jax.random.split(key, 4)
    bound = 1.0 / jnp.sqrt(hidden)
    return {
        # nn.Linear(hidden, hidden): weight (out, in), bias (out,)
        "w1": jax.random.uniform(k1, (hidden, hidden), jnp.float32, -bound, bound),
        "b1": jax.random.uniform(k2, (hidden,), jnp.float32, -bound, bound),
        "w2": jax.random.uniform(k3, (hidden, hidden), jnp.float32, -bound, bound),
        "b2": jax.random.uniform(k4, (hidden,), jnp.float32, -bound, bound),
        # nn.LayerNorm(hidden): weight=1, bias=0
        "g1": jnp.ones((hidden,), jnp.float32),
        "be1": jnp.zeros((hidden,), jnp.float32),
        "g2": jnp.ones((hidden,), jnp.float32),
        "be2": jnp.zeros((hidden,), jnp.float32),
    }


def _reference(x, p, matmul_dtype=jnp.float32):
    """Pure-JAX reference. matmul_dtype=bf16 mirrors the kernel's MXU recipe."""
    def mm(a, w):
        return jnp.dot(a.astype(matmul_dtype), w.T.astype(matmul_dtype),
                       preferred_element_type=jnp.float32)

    def ln(h, g, b):
        mu = h.mean(-1, keepdims=True)
        var = ((h - mu) ** 2).mean(-1, keepdims=True)
        return (h - mu) / jnp.sqrt(var + _LN_EPS) * g + b

    h = mm(x, p["w1"]) + p["b1"]
    h = ln(h, p["g1"], p["be1"])
    h = 0.5 * h * (1.0 + jax.lax.erf(h * _INV_SQRT2))
    h = mm(h, p["w2"]) + p["b2"]
    h = ln(h, p["g2"], p["be2"])
    return x + h


if __name__ == "__main__":
    key = jax.random.PRNGKey(0)
    kx, kp = jax.random.split(key)

    batch, seq, hidden = 2, 8, 32
    x = jax.random.normal(kx, (batch, seq, hidden), jnp.float32)
    params = init_params(kp, hidden)
    prepped = prepare_params(params)          # one-time: transpose / pad / bf16-cast

    out = residual_block(x, prepped)
    out = jax.block_until_ready(out)

    assert out.shape == x.shape and out.dtype == x.dtype

    # Tight check vs a reference using the same bf16-matmul / f32-accumulate recipe.
    ref_bf16 = _reference(x, params, matmul_dtype=jnp.bfloat16)
    assert jnp.max(jnp.abs(out - ref_bf16)) < 1e-3, "mismatch vs bf16-matmul reference"

    # Looser check vs the exact f32 PyTorch-semantics reference.
    ref_f32 = _reference(x, params, matmul_dtype=jnp.float32)
    assert jnp.max(jnp.abs(out - ref_f32)) < 1e-1, "mismatch vs f32 reference"

    print("KERNEL_OK")
</pallas_src>

<mosaic_0001>
module attributes {stable_mosaic.version = 11 : i64} {
  func.func @_residual_block_kernel(%arg0: i32, %arg1: memref<8x128xf32, #tpu.memory_space<vmem>>, %arg2: memref<128x128xbf16, #tpu.memory_space<vmem>>, %arg3: memref<1x128xf32, #tpu.memory_space<vmem>>, %arg4: memref<1x128xf32, #tpu.memory_space<vmem>>, %arg5: memref<1x128xf32, #tpu.memory_space<vmem>>, %arg6: memref<128x128xbf16, #tpu.memory_space<vmem>>, %arg7: memref<1x128xf32, #tpu.memory_space<vmem>>, %arg8: memref<1x128xf32, #tpu.memory_space<vmem>>, %arg9: memref<1x128xf32, #tpu.memory_space<vmem>>, %arg10: memref<8x128xf32, #tpu.memory_space<vmem>>) attributes {dimension_semantics = [#tpu.dimension_semantics<parallel>], iteration_bounds = array<i64: 2>, scalar_prefetch = 0 : i64, scratch_operands = 0 : i64, tpu.core_type = #tpu.core_type<tc>, window_params = [{transform_indices = @transform_0, window_bounds = array<i64: 8, 128>}, {pipeline_mode = #tpu.pipeline_mode<synchronous>, transform_indices = @transform_1, window_bounds = array<i64: 128, 128>}, {pipeline_mode = #tpu.pipeline_mode<synchronous>, transform_indices = @transform_2, window_bounds = array<i64: 1, 128>}, {pipeline_mode = #tpu.pipeline_mode<synchronous>, transform_indices = @transform_3, window_bounds = array<i64: 1, 128>}, {pipeline_mode = #tpu.pipeline_mode<synchronous>, transform_indices = @transform_4, window_bounds = array<i64: 1, 128>}, {pipeline_mode = #tpu.pipeline_mode<synchronous>, transform_indices = @transform_5, window_bounds = array<i64: 128, 128>}, {pipeline_mode = #tpu.pipeline_mode<synchronous>, transform_indices = @transform_6, window_bounds = array<i64: 1, 128>}, {pipeline_mode = #tpu.pipeline_mode<synchronous>, transform_indices = @transform_7, window_bounds = array<i64: 1, 128>}, {pipeline_mode = #tpu.pipeline_mode<synchronous>, transform_indices = @transform_8, window_bounds = array<i64: 1, 128>}, {transform_indices = @transform_9, window_bounds = array<i64: 8, 128>}]} {
    %c0 = arith.constant 0 : index
    %c0_0 = arith.constant 0 : index
    %0 = vector.load %arg1[%c0, %c0_0] : memref<8x128xf32, #tpu.memory_space<vmem>>, vector<8x128xf32>
    %1 = arith.truncf %0 : vector<8x128xf32> to vector<8x128xbf16>
    %c0_1 = arith.constant 0 : index
    %c0_2 = arith.constant 0 : index
    %2 = vector.load %arg2[%c0_1, %c0_2] : memref<128x128xbf16, #tpu.memory_space<vmem>>, vector<128x128xbf16>
    %cst = arith.constant dense<0.000000e+00> : vector<8x128xf32>
    %3 = tpu.matmul %1, %2, %cst {dimension_numbers = #tpu.dot_dimension_numbers<[1], [0], [0], [1], [0, 0, 1, 1], [], []>} : vector<8x128xbf16>, vector<128x128xbf16>, vector<8x128xf32> -> vector<8x128xf32>
    %c0_3 = arith.constant 0 : index
    %c0_4 = arith.constant 0 : index
    %4 = vector.load %arg3[%c0_3, %c0_4] : memref<1x128xf32, #tpu.memory_space<vmem>>, vector<1x128xf32>
    %5 = vector.broadcast %4 : vector<1x128xf32> to vector<8x128xf32>
    %6 = arith.addf %3, %5 : vector<8x128xf32>
    %c0_5 = arith.constant 0 : index
    %c0_6 = arith.constant 0 : index
    %7 = vector.load %arg4[%c0_5, %c0_6] : memref<1x128xf32, #tpu.memory_space<vmem>>, vector<1x128xf32>
    %c0_7 = arith.constant 0 : index
    %c0_8 = arith.constant 0 : index
    %8 = vector.load %arg5[%c0_7, %c0_8] : memref<1x128xf32, #tpu.memory_space<vmem>>, vector<1x128xf32>
    %cst_9 = arith.constant dense<0.000000e+00> : vector<8xf32>
    %9 = vector.multi_reduction <add>, %6, %cst_9 [1] : vector<8x128xf32> to vector<8xf32>
    %10 = vector.shape_cast %9 : vector<8xf32> to vector<8x1xf32>
    %cst_10 = arith.constant 3.125000e-02 : f32
    %11 = vector.broadcast %cst_10 : f32 to vector<8x1xf32>
    %12 = arith.mulf %10, %11 : vector<8x1xf32>
    %13 = arith.mulf %6, %6 : vector<8x128xf32>
    %cst_11 = arith.constant dense<0.000000e+00> : vector<8xf32>
    %14 = vector.multi_reduction <add>, %13, %cst_11 [1] : vector<8x128xf32> to vector<8xf32>
    %15 = vector.shape_cast %14 : vector<8xf32> to vector<8x1xf32>
    %cst_12 = arith.constant 3.125000e-02 : f32
    %16 = vector.broadcast %cst_12 : f32 to vector<8x1xf32>
    %17 = arith.mulf %15, %16 : vector<8x1xf32>
    %18 = arith.mulf %12, %12 : vector<8x1xf32>
    %19 = arith.subf %17, %18 : vector<8x1xf32>
    %cst_13 = arith.constant 0.000000e+00 : f32
    %20 = vector.broadcast %cst_13 : f32 to vector<8x1xf32>
    %21 = arith.maximumf %19, %20 : vector<8x1xf32>
    %22 = vector.broadcast %12 : vector<8x1xf32> to vector<8x128xf32>
    %23 = arith.subf %6, %22 : vector<8x128xf32>
    %cst_14 = arith.constant 9.99999974E-6 : f32
    %24 = vector.broadcast %cst_14 : f32 to vector<8x1xf32>
    %25 = arith.addf %21, %24 : vector<8x1xf32>
    %26 = math.rsqrt %25 : vector<8x1xf32>
    %27 = vector.broadcast %26 : vector<8x1xf32> to vector<8x128xf32>
    %28 = arith.mulf %23, %27 : vector<8x128xf32>
    %29 = vector.broadcast %7 : vector<1x128xf32> to vector<8x128xf32>
    %30 = arith.mulf %28, %29 : vector<8x128xf32>
    %31 = vector.broadcast %8 : vector<1x128xf32> to vector<8x128xf32>
    %32 = arith.addf %30, %31 : vector<8x128xf32>
    %cst_15 = arith.constant 5.000000e-01 : f32
    %33 = vector.broadcast %cst_15 : f32 to vector<8x128xf32>
    %34 = arith.mulf %33, %32 : vector<8x128xf32>
    %cst_16 = arith.constant 0.707106769 : f32
    %35 = vector.broadcast %cst_16 : f32 to vector<8x128xf32>
    %36 = arith.mulf %32, %35 : vector<8x128xf32>
    %37 = math.erf %36 : vector<8x128xf32>
    %cst_17 = arith.constant 1.000000e+00 : f32
    %38 = vector.broadcast %cst_17 : f32 to vector<8x128xf32>
    %39 = arith.addf %38, %37 : vector<8x128xf32>
    %40 = arith.mulf %34, %39 : vector<8x128xf32>
    %41 = arith.truncf %40 : vector<8x128xf32> to vector<8x128xbf16>
    %c0_18 = arith.constant 0 : index
    %c0_19 = arith.constant 0 : index
    %42 = vector.load %arg6[%c0_18, %c0_19] : memref<128x128xbf16, #tpu.memory_space<vmem>>, vector<128x128xbf16>
    %cst_20 = arith.constant dense<0.000000e+00> : vector<8x128xf32>
    %43 = tpu.matmul %41, %42, %cst_20 {dimension_numbers = #tpu.dot_dimension_numbers<[1], [0], [0], [1], [0, 0, 1, 1], [], []>} : vector<8x128xbf16>, vector<128x128xbf16>, vector<8x128xf32> -> vector<8x128xf32>
    %c0_21 = arith.constant 0 : index
    %c0_22 = arith.constant 0 : index
    %44 = vector.load %arg7[%c0_21, %c0_22] : memref<1x128xf32, #tpu.memory_space<vmem>>, vector<1x128xf32>
    %45 = vector.broadcast %44 : vector<1x128xf32> to vector<8x128xf32>
    %46 = arith.addf %43, %45 : vector<8x128xf32>
    %c0_23 = arith.constant 0 : index
    %c0_24 = arith.constant 0 : index
    %47 = vector.load %arg8[%c0_23, %c0_24] : memref<1x128xf32, #tpu.memory_space<vmem>>, vector<1x128xf32>
    %c0_25 = arith.constant 0 : index
    %c0_26 = arith.constant 0 : index
    %48 = vector.load %arg9[%c0_25, %c0_26] : memref<1x128xf32, #tpu.memory_space<vmem>>, vector<1x128xf32>
    %cst_27 = arith.constant dense<0.000000e+00> : vector<8xf32>
    %49 = vector.multi_reduction <add>, %46, %cst_27 [1] : vector<8x128xf32> to vector<8xf32>
    %50 = vector.shape_cast %49 : vector<8xf32> to vector<8x1xf32>
    %cst_28 = arith.constant 3.125000e-02 : f32
    %51 = vector.broadcast %cst_28 : f32 to vector<8x1xf32>
    %52 = arith.mulf %50, %51 : vector<8x1xf32>
    %53 = arith.mulf %46, %46 : vector<8x128xf32>
    %cst_29 = arith.constant dense<0.000000e+00> : vector<8xf32>
    %54 = vector.multi_reduction <add>, %53, %cst_29 [1] : vector<8x128xf32> to vector<8xf32>
    %55 = vector.shape_cast %54 : vector<8xf32> to vector<8x1xf32>
    %cst_30 = arith.constant 3.125000e-02 : f32
    %56 = vector.broadcast %cst_30 : f32 to vector<8x1xf32>
    %57 = arith.mulf %55, %56 : vector<8x1xf32>
    %58 = arith.mulf %52, %52 : vector<8x1xf32>
    %59 = arith.subf %57, %58 : vector<8x1xf32>
    %cst_31 = arith.constant 0.000000e+00 : f32
    %60 = vector.broadcast %cst_31 : f32 to vector<8x1xf32>
    %61 = arith.maximumf %59, %60 : vector<8x1xf32>
    %62 = vector.broadcast %52 : vector<8x1xf32> to vector<8x128xf32>
    %63 = arith.subf %46, %62 : vector<8x128xf32>
    %cst_32 = arith.constant 9.99999974E-6 : f32
    %64 = vector.broadcast %cst_32 : f32 to vector<8x1xf32>
    %65 = arith.addf %61, %64 : vector<8x1xf32>
    %66 = math.rsqrt %65 : vector<8x1xf32>
    %67 = vector.broadcast %66 : vector<8x1xf32> to vector<8x128xf32>
    %68 = arith.mulf %63, %67 : vector<8x128xf32>
    %69 = vector.broadcast %47 : vector<1x128xf32> to vector<8x128xf32>
    %70 = arith.mulf %68, %69 : vector<8x128xf32>
    %71 = vector.broadcast %48 : vector<1x128xf32> to vector<8x128xf32>
    %72 = arith.addf %70, %71 : vector<8x128xf32>
    %73 = arith.addf %0, %72 : vector<8x128xf32>
    %c0_33 = arith.constant 0 : index
    %c0_34 = arith.constant 0 : index
    %74 = vector.load %arg10[%c0_33, %c0_34] : memref<8x128xf32, #tpu.memory_space<vmem>>, vector<8x128xf32>
    tpu.vector_store %arg10[%c0_33, %c0_34], %73 {strides = array<i32>} : memref<8x128xf32, #tpu.memory_space<vmem>>, vector<8x128xf32>,
    return
  }
  func.func @transform_0(%arg0: i32) -> (i32, i32) {
    %c0_i32 = arith.constant 0 : i32
    %c0_i32_0 = arith.constant 0 : i32
    return %arg0, %c0_i32 : i32, i32
  }
  func.func @transform_1(%arg0: i32) -> (i32, i32) {
    %c0_i32 = arith.constant 0 : i32
    %c0_i32_0 = arith.constant 0 : i32
    %c0_i32_1 = arith.constant 0 : i32
    return %c0_i32, %c0_i32_0 : i32, i32
  }
  func.func @transform_2(%arg0: i32) -> (i32, i32) {
    %c0_i32 = arith.constant 0 : i32
    %c0_i32_0 = arith.constant 0 : i32
    %c0_i32_1 = arith.constant 0 : i32
    return %c0_i32, %c0_i32_0 : i32, i32
  }
  func.func @transform_3(%arg0: i32) -> (i32, i32) {
    %c0_i32 = arith.constant 0 : i32
    %c0_i32_0 = arith.constant 0 : i32
    %c0_i32_1 = arith.constant 0 : i32
    return %c0_i32, %c0_i32_0 : i32, i32
  }
  func.func @transform_4(%arg0: i32) -> (i32, i32) {
    %c0_i32 = arith.constant 0 : i32
    %c0_i32_0 = arith.constant 0 : i32
    %c0_i32_1 = arith.constant 0 : i32
    return %c0_i32, %c0_i32_0 : i32, i32
  }
  func.func @transform_5(%arg0: i32) -> (i32, i32) {
    %c0_i32 = arith.constant 0 : i32
    %c0_i32_0 = arith.constant 0 : i32
    %c0_i32_1 = arith.constant 0 : i32
    return %c0_i32, %c0_i32_0 : i32, i32
  }
  func.func @transform_6(%arg0: i32) -> (i32, i32) {
    %c0_i32 = arith.constant 0 : i32
    %c0_i32_0 = arith.constant 0 : i32
    %c0_i32_1 = arith.constant 0 : i32
    return %c0_i32, %c0_i32_0 : i32, i32
  }
  func.func @transform_7(%arg0: i32) -> (i32, i32) {
    %c0_i32 = arith.constant 0 : i32
    %c0_i32_0 = arith.constant 0 : i32
    %c0_i32_1 = arith.constant 0 : i32
    return %c0_i32, %c0_i32_0 : i32, i32
  }
  func.func @transform_8(%arg0: i32) -> (i32, i32) {
    %c0_i32 = arith.constant 0 : i32
    %c0_i32_0 = arith.constant 0 : i32
    %c0_i32_1 = arith.constant 0 : i32
    return %c0_i32, %c0_i32_0 : i32, i32
  }
  func.func @transform_9(%arg0: i32) -> (i32, i32) {
    %c0_i32 = arith.constant 0 : i32
    %c0_i32_0 = arith.constant 0 : i32
    return %arg0, %c0_i32 : i32, i32
  }
}

</mosaic_0001>

<bundles_post_ra>
// kernel: residual_block.1
= control target key start
LH: loop header
LB: loop body
LE: loop exit
PB: predicated region body
PF: predicated region fallthrough
CT: control target
= control target key end

     0   :  { %14 = vsyncpa [#allocation3], 0  ;;  %s1057_s0 = inlined_call_operand.vmem [shape: f32[16,128], index: 0, kind: input, shape index: {}]   ;;  %s1058_s1 = inlined_call_operand.hbm [shape: bf16[128,128], index: 1, kind: input, shape index: {}]   ;;  %s1059_s2 = inlined_call_operand.vmem [shape: f32[1,128], index: 2, kind: input, shape index: {}]   ;;  %s1060_s3 = inlined_call_operand.vmem [shape: f32[1,128], index: 3, kind: input, shape index: {}]   ;;  %s1061_s4 = inlined_call_operand.vmem [shape: f32[1,128], index: 4, kind: input, shape index: {}]   ;;  %s1062_s5 = inlined_call_operand.hbm [shape: bf16[128,128], index: 5, kind: input, shape index: {}]   ;;  %s1063_s6 = inlined_call_operand.vmem [shape: f32[1,128], index: 6, kind: input, shape index: {}]   ;;  %s1064_s7 = inlined_call_operand.vmem [shape: f32[1,128], index: 7, kind: input, shape index: {}]   ;;  %s1065_s8 = inlined_call_operand.vmem [shape: f32[1,128], index: 8, kind: input, shape index: {}]   ;;  %s1066_s9 = inlined_call_operand.vmem [shape: f32[16,128], index: 9, kind: output, shape index: {}]  }
   0x1   :  { %15 = vsyncpa [#allocation5], 0  ;;  %s981_s30 = smov 0  }
   0x2 LB: > { %s257_s12 = sshll.u32 %s1058_s1, 4  ;;  %s990_s13 = sadd.s32 4294967295, %s925_s30   ;;  %s925_s30 = sphi %s981_s30, %s21_s30   ;;  %s258_s12 = int_to_ptr.hbm [resolvable:$true] %s257_s12 }
   0x3   : > { %p716_p0 = scmp.ge.s32.totalorder %s925_s30, 1  ;;  %p246_p1 = scmp.lt.s32.totalorder %s925_s30, 3 }
   0x4   : > { %p823_p2 = scmp.eq.s32.totalorder %s990_s13, 0  ;;  %s927_s15 = smov [#allocation2]  }
   0x5   : > { %p995_p3 = pnand %p716_p0, %p246_p1  ;;  %s259_s16 = sshll.u32 %s927_s15, 4  ;;  %s260_s16 = int_to_ptr.vmem [resolvable:$true] %s259_s16 }
   0x6   : > { %s280_s19 = sshll.u32 %s1062_s5, 4  ;;  %s928_s20 = smov [#allocation4]   ;;  %s281_s19 = int_to_ptr.hbm [resolvable:$true] %s280_s19 }
   0x7   : > { %p816_p4 = pneg %p995_p3  ;;  %s282_s21 = sshll.u32 %s928_s20, 4  ;;  %s283_s21 = int_to_ptr.vmem [resolvable:$true] %s282_s21 }
   0x8   : > { %s929_s22 = smov 64   ;;  %s930_s23 = smov 4  }
   0x9   : > { %p817_p5 = pnand %p823_p2, %p816_p4  ;;  %314 = sbr.rel (%p995_p3) target bundleno = 673 (0x2a1), region = 56 }
   0xb   : > { %819 = dma.hbm_to_vmem [thread:$0]  (!%p817_p5), %s258_s12, 1024, %s260_s16, [#allocation3], %s929_s22, %s929_s22, %s930_s23  }
   0xc   : > { %822 = dma.hbm_to_vmem [thread:$0]  (!%p817_p5), %s281_s19, 1024, %s283_s21, [#allocation5], %s929_s22, %s929_s22, %s930_s23  }
   0xe   : > { %916 = dma.done.wait (%p823_p2), [#allocation3], 1024  }
   0xf   : > { %918 = vsyncadd (%p823_p2), [#allocation3], 4294966272 }
  0x10   : > { %920 = dma.done.wait (%p823_p2), [#allocation5], 1024  }
  0x11   : > { %922 = vsyncadd (%p823_p2), [#allocation5], 4294966272  ;;  %v799_v0 = vld [vmem:[#allocation2 + $0x38] sm:$0xff]  ;;  %v798_v1 = vld [vmem:[#allocation2 + $0x30] sm:$0xff]  ;;  %p354_p6 = scmp.lt.s32.totalorder %s990_s13, 1 }
  0x12   : > { %432 = vmatpush.bf16.msra.mxu0 %v799_v0  ;;  %v797_v2 = vld [vmem:[#allocation2 + $0x28] sm:$0xff]  ;;  %v796_v3 = vld [vmem:[#allocation2 + $0x20] sm:$0xff]  ;;  %v795_v4 = vld [vmem:[#allocation2 + $0x18] sm:$0xff] }
  0x13   : > { %s1069_s13 = smov (!%p354_p6, %s990_s13), 1  ;;  %v794_v5 = vld [vmem:[#allocation2 + $0x10] sm:$0xff]  ;;  %v793_v6 = vld [vmem:[#allocation2 + $0x8] sm:$0xff]  ;;  %v792_v7 = vld [vmem:[#allocation2] sm:$0xff] }
  0x14   : > { %s723_s24 = sshll.u32 %s1069_s13, 3  ;;  %v839_v10 = vld [vmem:[%s1059_s2] ss:$0 sm:$0xff]  ;;  %v807_v16 = vld [vmem:[#allocation4 + $0x38] sm:$0xff]  ;;  %v806_v17 = vld [vmem:[#allocation4 + $0x30] sm:$0xff] }
  0x15   : > { %s357_s27 = scalar_lea.vmem %s1057_s0, %s723_s24  ;;  %591 = vmatpush.bf16.msra.mxu1 %v807_v16  ;;  %v805_v20 = vld [vmem:[#allocation4 + $0x28] sm:$0xff]  ;;  %v804_v24 = vld [vmem:[#allocation4 + $0x20] sm:$0xff]  ;;  %v803_v27 = vld [vmem:[#allocation4 + $0x18] sm:$0xff]  ;;  %s361_s23 = scalar_lea.vmem %s1066_s9, %s723_s24 }
  0x16   : > { %433 = vmatpush.bf16.msra.mxu0 %v798_v1  ;;  %v1026_v8 = vld [vmem:[%s357_s27] sm:$0xff]  ;;  %v802_v28 = vld [vmem:[#allocation4 + $0x10] sm:$0xff]  ;;  %v801_v31 = vld [vmem:[#allocation4 + $0x8] sm:$0xff] }
  0x17   : > { %v363_v9 = vpack.c.bf16 %v1026_v8, %v1026_v8  ;;  %v800_v34 = vld [vmem:[#allocation4] sm:$0xff] }
  0x18   : > { %v840_v38 = vld [vmem:[%s1060_s3] ss:$0 sm:$0xff] }
  0x19   : > { %592 = vmatpush.bf16.msra.mxu1 %v806_v17  ;;  %v841_v41 = vld [vmem:[%s1061_s4] ss:$0 sm:$0xff] }
  0x1a   : > { %434 = vmatpush.bf16.msra.mxu0 %v797_v2 }
  0x1d   : > { %593 = vmatpush.bf16.msra.mxu1 %v805_v20 }
  0x1e   : > { %435 = vmatpush.bf16.msra.mxu0 %v796_v3 }
  0x21   : > { %594 = vmatpush.bf16.msra.mxu1 %v804_v24 }
  0x22   : > { %436 = vmatpush.bf16.msra.mxu0 %v795_v4 }
  0x25   : > { %595 = vmatpush.bf16.msra.mxu1 %v803_v27 }
  0x26   : > { %437 = vmatpush.bf16.msra.mxu0 %v794_v5 }
  0x29   : > { %596 = vmatpush.bf16.msra.mxu1 %v802_v28 }
  0x2a   : > { %438 = vmatpush.bf16.msra.mxu0 %v793_v6 }
  0x2d   : > { %597 = vmatpush.bf16.msra.mxu1 %v801_v31 }
  0x2e   : > { %439 = vmatpush.bf16.msra.mxu0 %v792_v7 }
  0x31   : > { %440 = vmatmul.bf16.vlgmr.msra.gmra.mxu0 %v363_v9  ;;  %598 = vmatpush.bf16.msra.mxu1 %v800_v34 }
  0xae   : > { %v441_v11 = vpop.f32.mrf.mxu0 }
  0xaf   : > { %v442_v12 = vadd.f32 %v839_v10, %v441_v11 }
  0xb1   : > { %447 = vadd.xlane.f32.xlu0 %v442_v12  ;;  %v450_v14 = vmul.f32 %v442_v12, %v442_v12 }
  0xb6   : > { %v443_v13 = vpop.f32.mrf.mxu0 }
  0xb9   : > { %451 = vadd.xlane.f32.xlu0 %v450_v14 }
 0x124   : > { %v448_v15 = vpop.xlane.xlu0 %447 }
 0x125   : > { %v449_v18 = vmul.f32 0.03125, %v448_v15 }
 0x127   : > { %v454_v21 = vmul.f32 %v449_v18, %v449_v18  ;;  %v457_v37 = vsub.f32 %v442_v12, %v449_v18 }
 0x12c   : > { %v452_v19 = vpop.xlane.xlu0 %451 }
 0x12d   : > { %v453_v22 = vmul.f32 0.03125, %v452_v19 }
 0x12f   : > { %v455_v23 = vsub.f32 %v453_v22, %v454_v21  ;;  %v842_v21 = vld [vmem:[%s1063_s6] ss:$0 sm:$0xff] }
 0x131   : > { %v456_v25 = vmax.f32 %v455_v23, 0.0 }
 0x133   : > { %v458_v26 = vadd.f32 1e-05, %v456_v25 }
 0x135   : > { %845 = vrsqrt.f32 %v458_v26  ;;  %vm465_vm1 = vweird.f32 %v458_v26 }
 0x13b   : > { %v846_v29 = vpop.eup %845 }
 0x13c   : > { %v460_v30 = vmul.f32 %v846_v29, %v458_v26  ;;  %vm466_vm0 = vweird.f32 %v846_v29 }
 0x13d   : > { %vm467_vm2 = vmor %vm465_vm1, %vm466_vm0 }
 0x13e   : > { %v461_v32 = vmul.f32 %v846_v29, %v460_v30 }
 0x140   : > { %v462_v33 = vmul.f32 0.5, %v461_v32 }
 0x142   : > { %v463_v35 = vsub.f32 1.5, %v462_v33 }
 0x144   : > { %v464_v36 = vmul.f32 %v846_v29, %v463_v35 }
 0x146   : > { %v468_v39 = vsel %vm467_vm2, %v846_v29, %v464_v36 }
 0x147   : > { %v469_v40 = vmul.f32 %v468_v39, %v457_v37 }
 0x149   : > { %v473_v42 = vmul.f32 %v840_v38, %v469_v40 }
 0x14b   : > { %v477_v43 = vadd.f32 %v841_v41, %v473_v42  ;;  %v843_v41 = vld [vmem:[%s1064_s7] ss:$0 sm:$0xff] }
 0x14d   : > { %v479_v44 = vmul.f32 0.70710677, %v477_v43  ;;  %v478_v17 = vmul.f32 0.5, %v477_v43  ;;  %v844_v43 = vld [vmem:[%s1065_s8] ss:$0 sm:$0xff] }
 0x14f   : > { %v480_v45 = vmul.f32 %v479_v44, %v479_v44 }
 0x151   : > { %v481_v46 = vmin.f32 %v480_v45, 16.0 }
 0x153   : > { %v482_v47 = vmul.f32 2.1237322e-06, %v481_v46  ;;  %v493_v48 = vmul.f32 3.8918573e-05, %v481_v46 }
 0x155   : > { %v483_v49 = vadd.f32 0.00028619796, %v482_v47  ;;  %v494_v50 = vadd.f32 0.001143296, %v493_v48 }
 0x157   : > { %v484_v51 = vmul.f32 %v483_v49, %v481_v46  ;;  %v495_v52 = vmul.f32 %v494_v50, %v481_v46 }
 0x159   : > { %v496_v53 = vadd.f32 0.014752088, %v495_v52  ;;  %v485_v54 = vadd.f32 0.0036580483, %v484_v51 }
 0x15b   : > { %v497_v55 = vmul.f32 %v496_v53, %v481_v46  ;;  %v486_v57 = vmul.f32 %v485_v54, %v481_v46 }
 0x15d   : > { %v498_v56 = vadd.f32 0.112945676, %v497_v55  ;;  %v487_v60 = vadd.f32 0.05243302, %v486_v57 }
 0x15f   : > { %v499_v58 = vmul.f32 %v498_v56, %v481_v46  ;;  %v488_v63 = vmul.f32 %v487_v60, %v481_v46 }
 0x161   : > { %v500_v59 = vadd.f32 0.4994258, %v499_v58  ;;  %v489_v0 = vadd.f32 0.18741608, %v488_v63 }
 0x163   : > { %v501_v61 = vmul.f32 %v500_v59, %v481_v46  ;;  %v490_v2 = vmul.f32 %v489_v0, %v481_v46 }
 0x165   : > { %v502_v62 = vadd.f32 1.0, %v501_v61  ;;  %v491_v6 = vadd.f32 1.1283791, %v490_v2 }
 0x167   : > { %847 = vrcp.f32 %v502_v62  ;;  %v514_v5 = vand.u32 2147483648, %v502_v62  ;;  %v512_v9 = vand.u32 2147483647, %v502_v62  ;;  %vm508_vm4 = vweird.f32 %v502_v62 }
 0x168   : > { %v492_v12 = vmul.f32 %v491_v6, %v479_v44 }
 0x169   : > { %v515_v11 = vor.u32 1.1754944e-38, %v514_v5  ;;  %vm513_vm6 = vcmp.eq.f32.partialorder %v512_v9, 8.507059e+37 }
 0x16d   : > { %v848_v1 = vpop.eup %847 }
 0x16e   : > { %v504_v3 = vmul.f32 %v848_v1, %v502_v62  ;;  %vm509_vm3 = vweird.f32 %v848_v1 }
 0x16f   : > { %vm510_vm5 = vmor %vm508_vm4, %vm509_vm3 }
 0x170   : > { %v505_v4 = vsub.f32 1.0, %v504_v3 }
 0x172   : > { %v506_v7 = vmul.f32 %v848_v1, %v505_v4 }
 0x174   : > { %v507_v10 = vadd.f32 %v848_v1, %v506_v7 }
 0x176   : > { %v511_v13 = vsel %vm510_vm5, %v848_v1, %v507_v10 }
 0x177   : > { %v516_v14 = vsel %vm513_vm6, %v515_v11, %v511_v13 }
 0x178   : > { %v517_v15 = vmul.f32 %v516_v14, %v492_v12 }
 0x17a   : > { %v757_v16 = vclamps-f32 %v517_v15, 1.0 }
 0x17c   : > { %v520_v18 = vadd.f32 1.0, %v757_v16 }
 0x17e   : > { %v521_v19 = vmul.f32 %v520_v18, %v478_v17 }
 0x180   : > { %v522_v20 = vpack.c.bf16 %v521_v19, %v521_v19 }
 0x182   : > { %599 = vmatmul.bf16.vlgmr.msra.gmra.mxu1 %v522_v20 }
 0x1ff   : > { %v600_v22 = vpop.f32.mrf.mxu1 }
 0x200   : > { %v601_v23 = vadd.f32 %v842_v21, %v600_v22 }
 0x202   : > { %606 = vadd.xlane.f32.xlu1 %v601_v23  ;;  %v609_v25 = vmul.f32 %v601_v23, %v601_v23 }
 0x207   : > { %v602_v24 = vpop.f32.mrf.mxu1 }
 0x20a   : > { %610 = vadd.xlane.f32.xlu1 %v609_v25 }
 0x275   : > { %v607_v26 = vpop.xlane.xlu1 %606 }
 0x276   : > { %v608_v27 = vmul.f32 0.03125, %v607_v26 }
 0x278   : > { %v613_v29 = vmul.f32 %v608_v27, %v608_v27  ;;  %v616_v40 = vsub.f32 %v601_v23, %v608_v27 }
 0x27d   : > { %v611_v28 = vpop.xlane.xlu1 %610 }
 0x27e   : > { %v612_v30 = vmul.f32 0.03125, %v611_v28 }
 0x280   : > { %v614_v31 = vsub.f32 %v612_v30, %v613_v29 }
 0x282   : > { %v615_v32 = vmax.f32 %v614_v31, 0.0 }
 0x284   : > { %v617_v33 = vadd.f32 1e-05, %v615_v32 }
 0x286   : > { %849 = vrsqrt.f32 %v617_v33  ;;  %vm624_vm8 = vweird.f32 %v617_v33 }
 0x28c   : > { %v850_v34 = vpop.eup %849 }
 0x28d   : > { %v619_v35 = vmul.f32 %v850_v34, %v617_v33  ;;  %vm625_vm7 = vweird.f32 %v850_v34 }
 0x28e   : > { %vm626_vm9 = vmor %vm624_vm8, %vm625_vm7 }
 0x28f   : > { %v620_v36 = vmul.f32 %v850_v34, %v619_v35 }
 0x291   : > { %v621_v37 = vmul.f32 0.5, %v620_v36 }
 0x293   : > { %v622_v38 = vsub.f32 1.5, %v621_v37 }
 0x295   : > { %v623_v39 = vmul.f32 %v850_v34, %v622_v38 }
 0x297   : > { %v627_v42 = vsel %vm626_vm9, %v850_v34, %v623_v39 }
 0x298   : > { %v628_v44 = vmul.f32 %v627_v42, %v616_v40 }
 0x29a   : > { %v632_v45 = vmul.f32 %v843_v41, %v628_v44 }
 0x29c   : > { %v636_v46 = vadd.f32 %v844_v43, %v632_v45 }
 0x29e   : > { %v637_v47 = vadd.f32 %v636_v46, %v1026_v8 }
 0x2a0   : > { %638 = vst [vmem:[%s361_s23] sm:$0xff] %v637_v47 }
 0x2a1 PF: > { %s21_s30 = sadd.s32 1, %s925_s30  }
 0x2a2   : > { %p18_p7 = scmp.ge.s32.totalorder %s21_s30, 4  }
 0x2a4   :  { %20 = sbr.rel (!%p18_p7) target bundleno = 2 (0x2), region = 95 }
 0x2a9   :  { %658 = vsyncpa [#allocation3], 1 }
 0x2aa   :  { %660 = vsyncpa [#allocation3 + $0x1], 1 }
 0x2ab   :  { %661 = vsyncpa [#allocation5], 1 }

</bundles_post_ra>
